<compile_context>
chip_gen: v7x
topology: tpu7x:2x2x1
jax: 0.10.0
libtpu: 0.0.40
codegen_flags: <defaults>
</compile_context>

<pallas_src>
import jax
import jax.numpy as jnp
from jax import lax
from jax.experimental import pallas as pl
from jax.experimental.pallas import tpu as pltpu

BN_EPS = 1e-5


def _round_up(x, m):
  return ((x + m - 1) // m) * m


def _lane_tiling(m, want_blocks, tile_max=512):
  """Pick (padded lane extent, lane tile) for the spatial (lane) axis.

  Keeps m unpadded whenever the block can legally equal the full dim, pads to
  a multiple of 128 only when tiling is required, and tries to expose at least
  `want_blocks` lane blocks (so the v7x 2-TC megacore has parallel work even
  when the batch axis is 1).  tile_max=512 keeps double-buffered working sets
  comfortably inside every generation's scoped VMEM (v5e 16 MiB default).
  """
  if m % 128 != 0:
    if m <= tile_max:
      return m, m                 # full-dim lane block (exempt from 128 rule)
    mp = _round_up(m, 128)
  else:
    mp = m
  tm = min(tile_max, mp)
  while mp % tm:
    tm -= 128
  while want_blocks > 1 and mp // tm < want_blocks and tm % 256 == 0:
    tm //= 2
  return mp, tm


# ---------------------------------------------------------------------------
# Kernels
# ---------------------------------------------------------------------------
def _conv1x1_bn_relu_kernel(x_ref, w_ref, s_ref, o_ref):
  """o = relu(W @ X + s).

  x_ref: (K, TM)       input activations (cast to bf16 in-kernel)
  w_ref: (Co, K) bf16  conv weight with BN scale folded in
  s_ref: (Co, 1) f32   conv bias + BN shift
  o_ref: (Co, TM) f32
  """
  x = x_ref[...].astype(jnp.bfloat16)
  y = jnp.dot(w_ref[...], x, preferred_element_type=jnp.float32)
  o_ref[...] = jnp.maximum(y + s_ref[...], 0.0).astype(o_ref.dtype)


def _fused_downsample_kernel(xp_ref, w1_ref, s1_ref, w2_ref, s2_ref, o_ref):
  """Fused (1x1 conv + BN + ReLU) -> (dxd stride-d conv + BN + ReLU).

  xp_ref: (d*d, Ci, TM) bf16  space-to-depth input (one (Ci, TM) slab per
                              patch slot; TM indexes output pixels)
  w1_ref: (Co, Ci)  bf16      stage-1 weight (BN1 scale folded)
  s1_ref: (Co, 1)   f32       stage-1 bias + BN1 shift
  w2_ref: (d*d, Co2, Co) bf16 stage-2 weight per patch slot (BN2 scale folded)
  s2_ref: (Co2, 1)  f32       stage-2 bias + BN2 shift
  o_ref:  (Co2, TM) f32

  The stage-1 output `y` only ever lives in vregs/VMEM for the current tile.
  """
  dd = xp_ref.shape[0]
  acc = jnp.zeros(o_ref.shape, jnp.float32)
  for p in range(dd):  # d*d is small and static -> fully unrolled
    y = jnp.dot(w1_ref[...], xp_ref[p], preferred_element_type=jnp.float32)
    y = jnp.maximum(y + s1_ref[...], 0.0).astype(jnp.bfloat16)
    acc = acc + jnp.dot(w2_ref[p], y, preferred_element_type=jnp.float32)
  o_ref[...] = jnp.maximum(acc + s2_ref[...], 0.0).astype(o_ref.dtype)


# ---------------------------------------------------------------------------
# pallas_call wrappers
# ---------------------------------------------------------------------------
def _conv1x1_bn_relu(x3, w_bf16, shift, *, tile_max=512):
  """relu(W @ X + shift) with spatial on lanes, channels on sublanes.

  x3:     (N, K, M)  activations (f32 is fine; cast to bf16 inside the kernel)
  w_bf16: (Co, K) bf16 (BN scale folded)
  shift:  (Co,) f32
  returns (N, Co, M) f32
  """
  n, k, m = x3.shape
  co = w_bf16.shape[0]
  mp, tm = _lane_tiling(m, want_blocks=2 if n < 2 else 1, tile_max=tile_max)
  if mp != m:
    x3 = jnp.pad(x3, ((0, 0), (0, 0), (0, mp - m)))
  s2d = shift.astype(jnp.float32).reshape(co, 1)

  out = pl.pallas_call(
      _conv1x1_bn_relu_kernel,
      out_shape=jax.ShapeDtypeStruct((n, co, mp), jnp.float32),
      grid=(n, mp // tm),
      in_specs=[
          pl.BlockSpec((None, k, tm), lambda b, j: (b, 0, j)),
          pl.BlockSpec((co, k), lambda b, j: (0, 0)),
          pl.BlockSpec((co, 1), lambda b, j: (0, 0)),
      ],
      out_specs=pl.BlockSpec((None, co, tm), lambda b, j: (b, 0, j)),
      compiler_params=pltpu.CompilerParams(
          dimension_semantics=("parallel", "parallel")),
      cost_estimate=pl.CostEstimate(
          flops=2 * n * m * k * co,
          transcendentals=0,
          bytes_accessed=(x3.dtype.itemsize * n * k * m + 2 * k * co
                          + 4 * co + 4 * n * co * m)),
  )(x3, w_bf16, s2d)
  if mp != m:
    out = out[:, :, :m]
  return out


def _fused_conv1x1_downsample(xp, w1_bf16, shift1, w2_bf16, shift2, *,
                              tile_max=512):
  """Fused stage1 + stage2 (see _fused_downsample_kernel).

  xp:      (N, d*d, Ci, Mo) bf16, Mo = Ho*Wo
  w1_bf16: (Co, Ci) bf16;  shift1: (Co,) f32
  w2_bf16: (d*d, Co2, Co) bf16;  shift2: (Co2,) f32
  returns  (N, Co2, Mo) f32
  """
  n, dd, ci, mo = xp.shape
  co = w1_bf16.shape[0]
  co2 = w2_bf16.shape[1]
  mop, tmo = _lane_tiling(mo, want_blocks=2 if n < 2 else 1, tile_max=tile_max)
  if mop != mo:
    xp = jnp.pad(xp, ((0, 0), (0, 0), (0, 0), (0, mop - mo)))
  s1 = shift1.astype(jnp.float32).reshape(co, 1)
  s2 = shift2.astype(jnp.float32).reshape(co2, 1)

  out = pl.pallas_call(
      _fused_downsample_kernel,
      out_shape=jax.ShapeDtypeStruct((n, co2, mop), jnp.float32),
      grid=(n, mop // tmo),
      in_specs=[
          pl.BlockSpec((None, dd, ci, tmo), lambda b, j: (b, 0, 0, j)),
          pl.BlockSpec((co, ci), lambda b, j: (0, 0)),
          pl.BlockSpec((co, 1), lambda b, j: (0, 0)),
          pl.BlockSpec((dd, co2, co), lambda b, j: (0, 0, 0)),
          pl.BlockSpec((co2, 1), lambda b, j: (0, 0)),
      ],
      out_specs=pl.BlockSpec((None, co2, tmo), lambda b, j: (b, 0, j)),
      compiler_params=pltpu.CompilerParams(
          dimension_semantics=("parallel", "parallel")),
      cost_estimate=pl.CostEstimate(
          flops=2 * n * mo * dd * (ci * co + co * co2),
          transcendentals=0,
          bytes_accessed=(2 * n * dd * ci * mo + 2 * ci * co
                          + 2 * dd * co2 * co + 4 * (co + co2)
                          + 4 * n * co2 * mo)),
  )(xp, w1_bf16, s1, w2_bf16, s2)
  if mop != mo:
    out = out[:, :, :mo]
  return out


# ---------------------------------------------------------------------------
# BN folding + module forward
# ---------------------------------------------------------------------------
def _fold_bn(w2d, bias, gamma, beta, mean, var):
  """Fold eval-mode BatchNorm into a (Co, K) matmul weight + (Co,) shift.

  Done entirely in f32 (gamma / sqrt(var + eps) can have large dynamic range);
  callers cast the folded weight to bf16 afterwards.
  """
  w2d = w2d.astype(jnp.float32)
  s = gamma.astype(jnp.float32) / jnp.sqrt(var.astype(jnp.float32) + BN_EPS)
  w_folded = w2d * s[:, None]
  shift = (bias.astype(jnp.float32) - mean.astype(jnp.float32)) * s \
      + beta.astype(jnp.float32)
  return w_folded, shift


def cnn1x1_layer_forward(x, params, downsample=None):
  """JAX/Pallas equivalent of CNN1x1Layer.forward(x) (BatchNorm in eval mode).

  x: (N, Ci, H, W) float, NCHW like PyTorch.  Returns f32 NCHW.
  """
  x = jnp.asarray(x, jnp.float32)
  n, ci, h, w = x.shape

  w1 = params["conv1_w"]                                  # (Co, Ci, 1, 1)
  co = w1.shape[0]
  w1f, shift1 = _fold_bn(w1.reshape(co, ci), params["conv1_b"],
                         params["bn1_gamma"], params["bn1_beta"],
                         params["bn1_mean"], params["bn1_var"])
  w1_bf = w1f.astype(jnp.bfloat16)

  if not downsample:
    # Single kernel: 1x1 conv + BN + ReLU.  x viewed as (N, Ci, H*W) is a free
    # reshape of NCHW; the output comes back directly in NCHW.
    y = _conv1x1_bn_relu(x.reshape(n, ci, h * w), w1_bf, shift1)
    return y.reshape(n, co, h, w)

  d = int(downsample)
  ho, wo = h // d, w // d
  w2 = params["conv2_w"]                                  # (Co2, Co, d, d)
  co2 = w2.shape[0]
  w2f, shift2 = _fold_bn(w2.reshape(co2, co * d * d), params["conv2_b"],
                         params["bn2_gamma"], params["bn2_beta"],
                         params["bn2_mean"], params["bn2_var"])
  # (Co2, Co, d, d) scaled -> (d*d, Co2, Co): one (Co2, Co) matmul per patch
  # slot p = dy*d + dx, matching the xp layout below.
  w2_bf = (w2f.reshape(co2, co, d, d)
           .transpose(2, 3, 0, 1).reshape(d * d, co2, co).astype(jnp.bfloat16))

  # Space-to-depth on the INPUT (the 1x1 conv is per-pixel, so it commutes
  # with the patch permutation) -> the stage-1 intermediate never hits HBM.
  # The bf16 cast rides along with this single wrapper pass over x.
  xc = x[:, :, :ho * d, :wo * d]                          # PyTorch floor-crop
  xp = xc.reshape(n, ci, ho, d, wo, d)
  xp = jnp.transpose(xp, (0, 3, 5, 1, 2, 4))              # (N, dy, dx, Ci, Ho, Wo)
  xp = xp.reshape(n, d * d, ci, ho * wo).astype(jnp.bfloat16)

  z = _fused_conv1x1_downsample(xp, w1_bf, shift1, w2_bf, shift2)
  return z.reshape(n, co2, ho, wo)


# ---------------------------------------------------------------------------
# Pure-JAX reference (mirrors the PyTorch forward, eval-mode BN)
# ---------------------------------------------------------------------------
def _reference_forward(x, params, downsample=None):
  def bn_relu(z, g, b, m, v):
    s = g / jnp.sqrt(v + BN_EPS)
    return jnp.maximum(z * s[None, :, None, None]
                       + (b - m * s)[None, :, None, None], 0.0)

  z = lax.conv_general_dilated(
      x, params["conv1_w"], window_strides=(1, 1), padding="VALID",
      dimension_numbers=("NCHW", "OIHW", "NCHW"),
      precision=lax.Precision.HIGHEST) + params["conv1_b"][None, :, None, None]
  y = bn_relu(z, params["bn1_gamma"], params["bn1_beta"],
              params["bn1_mean"], params["bn1_var"])
  if downsample:
    d = int(downsample)
    z = lax.conv_general_dilated(
        y, params["conv2_w"], window_strides=(d, d), padding="VALID",
        dimension_numbers=("NCHW", "OIHW", "NCHW"),
        precision=lax.Precision.HIGHEST) + params["conv2_b"][None, :, None, None]
    y = bn_relu(z, params["bn2_gamma"], params["bn2_beta"],
                params["bn2_mean"], params["bn2_var"])
  return y


if __name__ == "__main__":
  key = jax.random.PRNGKey(0)
  keys = jax.random.split(key, 13)

  N, Ci, H, W = 2, 4, 16, 16
  Co = 8
  d = 2  # downsample factor

  x = jax.random.normal(keys[0], (N, Ci, H, W), dtype=jnp.float32)

  params = {
      "conv1_w": 0.3 * jax.random.normal(keys[1], (Co, Ci, 1, 1), jnp.float32),
      "conv1_b": 0.1 * jax.random.normal(keys[2], (Co,), jnp.float32),
      "bn1_gamma": 1.0 + 0.1 * jax.random.normal(keys[3], (Co,), jnp.float32),
      "bn1_beta": 0.1 * jax.random.normal(keys[4], (Co,), jnp.float32),
      "bn1_mean": 0.1 * jax.random.normal(keys[5], (Co,), jnp.float32),
      "bn1_var": 0.5 + jnp.abs(jax.random.normal(keys[6], (Co,), jnp.float32)),
      "conv2_w": 0.2 * jax.random.normal(keys[7], (Co, Co, d, d), jnp.float32),
      "conv2_b": 0.1 * jax.random.normal(keys[8], (Co,), jnp.float32),
      "bn2_gamma": 1.0 + 0.1 * jax.random.normal(keys[9], (Co,), jnp.float32),
      "bn2_beta": 0.1 * jax.random.normal(keys[10], (Co,), jnp.float32),
      "bn2_mean": 0.1 * jax.random.normal(keys[11], (Co,), jnp.float32),
      "bn2_var": 0.5 + jnp.abs(jax.random.normal(keys[12], (Co,), jnp.float32)),
  }

  fwd = jax.jit(cnn1x1_layer_forward, static_argnames=("downsample",))

  # Downsample path: fused (1x1 conv+BN+ReLU) -> (dxd stride-d conv+BN+ReLU).
  out = fwd(x, params, downsample=d)
  jax.block_until_ready(out)
  ref = _reference_forward(x, params, downsample=d)
  assert out.shape == (N, Co, H // d, W // d), out.shape
  assert jnp.allclose(out, ref, rtol=2e-2, atol=2e-2), (
      "max abs err", float(jnp.max(jnp.abs(out - ref))))

  # Pure 1x1 path (downsample=None).
  out1 = fwd(x, params, downsample=None)
  jax.block_until_ready(out1)
  ref1 = _reference_forward(x, params, downsample=None)
  assert out1.shape == (N, Co, H, W), out1.shape
  assert jnp.allclose(out1, ref1, rtol=2e-2, atol=2e-2), (
      "max abs err", float(jnp.max(jnp.abs(out1 - ref1))))

  print("KERNEL_OK")
</pallas_src>

<mosaic_0001>
module attributes {stable_mosaic.version = 11 : i64} {
  func.func @_fused_downsample_kernel(%arg0: i32, %arg1: i32, %arg2: memref<1x4x4x64xbf16, #tpu.memory_space<vmem>>, %arg3: memref<8x4xbf16, #tpu.memory_space<vmem>>, %arg4: memref<8x1xf32, #tpu.memory_space<vmem>>, %arg5: memref<4x8x8xbf16, #tpu.memory_space<vmem>>, %arg6: memref<8x1xf32, #tpu.memory_space<vmem>>, %arg7: memref<1x8x64xf32, #tpu.memory_space<vmem>>) attributes {dimension_semantics = [#tpu.dimension_semantics<parallel>, #tpu.dimension_semantics<parallel>], iteration_bounds = array<i64: 2, 1>, scalar_prefetch = 0 : i64, scratch_operands = 0 : i64, tpu.core_type = #tpu.core_type<tc>, window_params = [{transform_indices = @transform_0, window_bounds = array<i64: 1, 4, 4, 64>}, {pipeline_mode = #tpu.pipeline_mode<synchronous>, transform_indices = @transform_1, window_bounds = array<i64: 8, 4>}, {pipeline_mode = #tpu.pipeline_mode<synchronous>, transform_indices = @transform_2, window_bounds = array<i64: 8, 1>}, {pipeline_mode = #tpu.pipeline_mode<synchronous>, transform_indices = @transform_3, window_bounds = array<i64: 4, 8, 8>}, {pipeline_mode = #tpu.pipeline_mode<synchronous>, transform_indices = @transform_4, window_bounds = array<i64: 8, 1>}, {transform_indices = @transform_5, window_bounds = array<i64: 1, 8, 64>}]} {
    %cst = arith.constant 0.000000e+00 : f32
    %0 = vector.broadcast %cst : f32 to vector<8x64xf32>
    %c0 = arith.constant 0 : index
    %c0_0 = arith.constant 0 : index
    %1 = vector.load %arg3[%c0, %c0_0] : memref<8x4xbf16, #tpu.memory_space<vmem>>, vector<8x4xbf16>
    %c0_1 = arith.constant 0 : index
    %c0_2 = arith.constant 0 : index
    %c0_3 = arith.constant 0 : index
    %c0_4 = arith.constant 0 : index
    %2 = vector.load %arg2[%c0_1, %c0_2, %c0_3, %c0_4] : memref<1x4x4x64xbf16, #tpu.memory_space<vmem>>, vector<1x1x4x64xbf16>
    %3 = vector.shape_cast %2 : vector<1x1x4x64xbf16> to vector<4x64xbf16>
    %cst_5 = arith.constant dense<0.000000e+00> : vector<8x64xf32>
    %4 = tpu.matmul %1, %3, %cst_5 {dimension_numbers = #tpu.dot_dimension_numbers<[1], [0], [0], [1], [0, 0, 1, 1], [], []>} : vector<8x4xbf16>, vector<4x64xbf16>, vector<8x64xf32> -> vector<8x64xf32>
    %c0_6 = arith.constant 0 : index
    %c0_7 = arith.constant 0 : index
    %5 = vector.load %arg4[%c0_6, %c0_7] : memref<8x1xf32, #tpu.memory_space<vmem>>, vector<8x1xf32>
    %6 = vector.broadcast %5 : vector<8x1xf32> to vector<8x64xf32>
    %7 = arith.addf %4, %6 : vector<8x64xf32>
    %cst_8 = arith.constant 0.000000e+00 : f32
    %8 = vector.broadcast %cst_8 : f32 to vector<8x64xf32>
    %9 = arith.maximumf %7, %8 : vector<8x64xf32>
    %10 = arith.truncf %9 : vector<8x64xf32> to vector<8x64xbf16>
    %c0_9 = arith.constant 0 : index
    %c0_10 = arith.constant 0 : index
    %c0_11 = arith.constant 0 : index
    %11 = vector.load %arg5[%c0_9, %c0_10, %c0_11] : memref<4x8x8xbf16, #tpu.memory_space<vmem>>, vector<1x8x8xbf16>
    %12 = vector.shape_cast %11 : vector<1x8x8xbf16> to vector<8x8xbf16>
    %cst_12 = arith.constant dense<0.000000e+00> : vector<8x64xf32>
    %13 = tpu.matmul %12, %10, %cst_12 {dimension_numbers = #tpu.dot_dimension_numbers<[1], [0], [0], [1], [0, 0, 1, 1], [], []>} : vector<8x8xbf16>, vector<8x64xbf16>, vector<8x64xf32> -> vector<8x64xf32>
    %14 = arith.addf %0, %13 : vector<8x64xf32>
    %c0_13 = arith.constant 0 : index
    %c0_14 = arith.constant 0 : index
    %15 = vector.load %arg3[%c0_13, %c0_14] : memref<8x4xbf16, #tpu.memory_space<vmem>>, vector<8x4xbf16>
    %c0_15 = arith.constant 0 : index
    %c1 = arith.constant 1 : index
    %c0_16 = arith.constant 0 : index
    %c0_17 = arith.constant 0 : index
    %16 = vector.load %arg2[%c0_15, %c1, %c0_16, %c0_17] : memref<1x4x4x64xbf16, #tpu.memory_space<vmem>>, vector<1x1x4x64xbf16>
    %17 = vector.shape_cast %16 : vector<1x1x4x64xbf16> to vector<4x64xbf16>
    %cst_18 = arith.constant dense<0.000000e+00> : vector<8x64xf32>
    %18 = tpu.matmul %15, %17, %cst_18 {dimension_numbers = #tpu.dot_dimension_numbers<[1], [0], [0], [1], [0, 0, 1, 1], [], []>} : vector<8x4xbf16>, vector<4x64xbf16>, vector<8x64xf32> -> vector<8x64xf32>
    %c0_19 = arith.constant 0 : index
    %c0_20 = arith.constant 0 : index
    %19 = vector.load %arg4[%c0_19, %c0_20] : memref<8x1xf32, #tpu.memory_space<vmem>>, vector<8x1xf32>
    %20 = vector.broadcast %19 : vector<8x1xf32> to vector<8x64xf32>
    %21 = arith.addf %18, %20 : vector<8x64xf32>
    %cst_21 = arith.constant 0.000000e+00 : f32
    %22 = vector.broadcast %cst_21 : f32 to vector<8x64xf32>
    %23 = arith.maximumf %21, %22 : vector<8x64xf32>
    %24 = arith.truncf %23 : vector<8x64xf32> to vector<8x64xbf16>
    %c1_22 = arith.constant 1 : index
    %c0_23 = arith.constant 0 : index
    %c0_24 = arith.constant 0 : index
    %25 = vector.load %arg5[%c1_22, %c0_23, %c0_24] : memref<4x8x8xbf16, #tpu.memory_space<vmem>>, vector<1x8x8xbf16>
    %26 = vector.shape_cast %25 : vector<1x8x8xbf16> to vector<8x8xbf16>
    %cst_25 = arith.constant dense<0.000000e+00> : vector<8x64xf32>
    %27 = tpu.matmul %26, %24, %cst_25 {dimension_numbers = #tpu.dot_dimension_numbers<[1], [0], [0], [1], [0, 0, 1, 1], [], []>} : vector<8x8xbf16>, vector<8x64xbf16>, vector<8x64xf32> -> vector<8x64xf32>
    %28 = arith.addf %14, %27 : vector<8x64xf32>
    %c0_26 = arith.constant 0 : index
    %c0_27 = arith.constant 0 : index
    %29 = vector.load %arg3[%c0_26, %c0_27] : memref<8x4xbf16, #tpu.memory_space<vmem>>, vector<8x4xbf16>
    %c0_28 = arith.constant 0 : index
    %c2 = arith.constant 2 : index
    %c0_29 = arith.constant 0 : index
    %c0_30 = arith.constant 0 : index
    %30 = vector.load %arg2[%c0_28, %c2, %c0_29, %c0_30] : memref<1x4x4x64xbf16, #tpu.memory_space<vmem>>, vector<1x1x4x64xbf16>
    %31 = vector.shape_cast %30 : vector<1x1x4x64xbf16> to vector<4x64xbf16>
    %cst_31 = arith.constant dense<0.000000e+00> : vector<8x64xf32>
    %32 = tpu.matmul %29, %31, %cst_31 {dimension_numbers = #tpu.dot_dimension_numbers<[1], [0], [0], [1], [0, 0, 1, 1], [], []>} : vector<8x4xbf16>, vector<4x64xbf16>, vector<8x64xf32> -> vector<8x64xf32>
    %c0_32 = arith.constant 0 : index
    %c0_33 = arith.constant 0 : index
    %33 = vector.load %arg4[%c0_32, %c0_33] : memref<8x1xf32, #tpu.memory_space<vmem>>, vector<8x1xf32>
    %34 = vector.broadcast %33 : vector<8x1xf32> to vector<8x64xf32>
    %35 = arith.addf %32, %34 : vector<8x64xf32>
    %cst_34 = arith.constant 0.000000e+00 : f32
    %36 = vector.broadcast %cst_34 : f32 to vector<8x64xf32>
    %37 = arith.maximumf %35, %36 : vector<8x64xf32>
    %38 = arith.truncf %37 : vector<8x64xf32> to vector<8x64xbf16>
    %c2_35 = arith.constant 2 : index
    %c0_36 = arith.constant 0 : index
    %c0_37 = arith.constant 0 : index
    %39 = vector.load %arg5[%c2_35, %c0_36, %c0_37] : memref<4x8x8xbf16, #tpu.memory_space<vmem>>, vector<1x8x8xbf16>
    %40 = vector.shape_cast %39 : vector<1x8x8xbf16> to vector<8x8xbf16>
    %cst_38 = arith.constant dense<0.000000e+00> : vector<8x64xf32>
    %41 = tpu.matmul %40, %38, %cst_38 {dimension_numbers = #tpu.dot_dimension_numbers<[1], [0], [0], [1], [0, 0, 1, 1], [], []>} : vector<8x8xbf16>, vector<8x64xbf16>, vector<8x64xf32> -> vector<8x64xf32>
    %42 = arith.addf %28, %41 : vector<8x64xf32>
    %c0_39 = arith.constant 0 : index
    %c0_40 = arith.constant 0 : index
    %43 = vector.load %arg3[%c0_39, %c0_40] : memref<8x4xbf16, #tpu.memory_space<vmem>>, vector<8x4xbf16>
    %c0_41 = arith.constant 0 : index
    %c3 = arith.constant 3 : index
    %c0_42 = arith.constant 0 : index
    %c0_43 = arith.constant 0 : index
    %44 = vector.load %arg2[%c0_41, %c3, %c0_42, %c0_43] : memref<1x4x4x64xbf16, #tpu.memory_space<vmem>>, vector<1x1x4x64xbf16>
    %45 = vector.shape_cast %44 : vector<1x1x4x64xbf16> to vector<4x64xbf16>
    %cst_44 = arith.constant dense<0.000000e+00> : vector<8x64xf32>
    %46 = tpu.matmul %43, %45, %cst_44 {dimension_numbers = #tpu.dot_dimension_numbers<[1], [0], [0], [1], [0, 0, 1, 1], [], []>} : vector<8x4xbf16>, vector<4x64xbf16>, vector<8x64xf32> -> vector<8x64xf32>
    %c0_45 = arith.constant 0 : index
    %c0_46 = arith.constant 0 : index
    %47 = vector.load %arg4[%c0_45, %c0_46] : memref<8x1xf32, #tpu.memory_space<vmem>>, vector<8x1xf32>
    %48 = vector.broadcast %47 : vector<8x1xf32> to vector<8x64xf32>
    %49 = arith.addf %46, %48 : vector<8x64xf32>
    %cst_47 = arith.constant 0.000000e+00 : f32
    %50 = vector.broadcast %cst_47 : f32 to vector<8x64xf32>
    %51 = arith.maximumf %49, %50 : vector<8x64xf32>
    %52 = arith.truncf %51 : vector<8x64xf32> to vector<8x64xbf16>
    %c3_48 = arith.constant 3 : index
    %c0_49 = arith.constant 0 : index
    %c0_50 = arith.constant 0 : index
    %53 = vector.load %arg5[%c3_48, %c0_49, %c0_50] : memref<4x8x8xbf16, #tpu.memory_space<vmem>>, vector<1x8x8xbf16>
    %54 = vector.shape_cast %53 : vector<1x8x8xbf16> to vector<8x8xbf16>
    %cst_51 = arith.constant dense<0.000000e+00> : vector<8x64xf32>
    %55 = tpu.matmul %54, %52, %cst_51 {dimension_numbers = #tpu.dot_dimension_numbers<[1], [0], [0], [1], [0, 0, 1, 1], [], []>} : vector<8x8xbf16>, vector<8x64xbf16>, vector<8x64xf32> -> vector<8x64xf32>
    %56 = arith.addf %42, %55 : vector<8x64xf32>
    %c0_52 = arith.constant 0 : index
    %c0_53 = arith.constant 0 : index
    %57 = vector.load %arg6[%c0_52, %c0_53] : memref<8x1xf32, #tpu.memory_space<vmem>>, vector<8x1xf32>
    %58 = vector.broadcast %57 : vector<8x1xf32> to vector<8x64xf32>
    %59 = arith.addf %56, %58 : vector<8x64xf32>
    %cst_54 = arith.constant 0.000000e+00 : f32
    %60 = vector.broadcast %cst_54 : f32 to vector<8x64xf32>
    %61 = arith.maximumf %59, %60 : vector<8x64xf32>
    %c0_55 = arith.constant 0 : index
    %c0_56 = arith.constant 0 : index
    %c0_57 = arith.constant 0 : index
    %62 = vector.load %arg7[%c0_55, %c0_56, %c0_57] : memref<1x8x64xf32, #tpu.memory_space<vmem>>, vector<1x8x64xf32>
    %63 = vector.shape_cast %62 : vector<1x8x64xf32> to vector<8x64xf32>
    %64 = vector.shape_cast %61 : vector<8x64xf32> to vector<1x8x64xf32>
    tpu.vector_store %arg7[%c0_55, %c0_56, %c0_57], %64 {strides = array<i32>} : memref<1x8x64xf32, #tpu.memory_space<vmem>>, vector<1x8x64xf32>,
    return
  }
  func.func @transform_0(%arg0: i32, %arg1: i32) -> (i32, i32, i32, i32) {
    %c0_i32 = arith.constant 0 : i32
    %c0_i32_0 = arith.constant 0 : i32
    %c0_i32_1 = arith.constant 0 : i32
    return %arg0, %c0_i32, %c0_i32_0, %arg1 : i32, i32, i32, i32
  }
  func.func @transform_1(%arg0: i32, %arg1: i32) -> (i32, i32) {
    %c0_i32 = arith.constant 0 : i32
    %c0_i32_0 = arith.constant 0 : i32
    %c0_i32_1 = arith.constant 0 : i32
    return %c0_i32, %c0_i32_0 : i32, i32
  }
  func.func @transform_2(%arg0: i32, %arg1: i32) -> (i32, i32) {
    %c0_i32 = arith.constant 0 : i32
    %c0_i32_0 = arith.constant 0 : i32
    %c0_i32_1 = arith.constant 0 : i32
    return %c0_i32, %c0_i32_0 : i32, i32
  }
  func.func @transform_3(%arg0: i32, %arg1: i32) -> (i32, i32, i32) {
    %c0_i32 = arith.constant 0 : i32
    %c0_i32_0 = arith.constant 0 : i32
    %c0_i32_1 = arith.constant 0 : i32
    %c0_i32_2 = arith.constant 0 : i32
    return %c0_i32, %c0_i32_0, %c0_i32_1 : i32, i32, i32
  }
  func.func @transform_4(%arg0: i32, %arg1: i32) -> (i32, i32) {
    %c0_i32 = arith.constant 0 : i32
    %c0_i32_0 = arith.constant 0 : i32
    %c0_i32_1 = arith.constant 0 : i32
    return %c0_i32, %c0_i32_0 : i32, i32
  }
  func.func @transform_5(%arg0: i32, %arg1: i32) -> (i32, i32, i32) {
    %c0_i32 = arith.constant 0 : i32
    %c0_i32_0 = arith.constant 0 : i32
    return %arg0, %c0_i32, %arg1 : i32, i32, i32
  }
}

</mosaic_0001>

<bundles_post_ra>
// kernel: cnn1x1_layer_forward.1
= control target key start
LH: loop header
LB: loop body
LE: loop exit
PB: predicated region body
PF: predicated region fallthrough
CT: control target
= control target key end

     0   :  { %s910_s18 = smov 0   ;;  %s912_s19 = smov 0   ;;  %s1017_s0 = inlined_call_operand.vmem [shape: bf16[2,4,4,64], index: 0, kind: input, shape index: {}]   ;;  %s1018_s1 = inlined_call_operand.vmem [shape: bf16[8,4], index: 1, kind: input, shape index: {}]   ;;  %s1019_s2 = inlined_call_operand.vmem [shape: f32[8,1], index: 2, kind: input, shape index: {}]   ;;  %s1020_s3 = inlined_call_operand.vmem [shape: bf16[4,8,8], index: 3, kind: input, shape index: {}]   ;;  %s1021_s4 = inlined_call_operand.vmem [shape: f32[8,1], index: 4, kind: input, shape index: {}]   ;;  %s1022_s5 = inlined_call_operand.vmem [shape: f32[2,8,64], index: 5, kind: output, shape index: {}]  }
   0x1   :  { %s914_s20 = smov 0  }
   0x2 LB: > { %s27_s21 = sadd.s32 1, %s871_s19  ;;  %p740_p0 = scmp.ge.s32.totalorder %s875_s20, 1  ;;  %s875_s20 = sphi %s914_s20, %s15_s20   ;;  %s871_s19 = sphi %s912_s19, %s1024_s19   ;;  %s867_s18 = sphi %s910_s18, %s1023_s18  }
   0x3   : > { %p29_p1 = scmp.ge.s32.totalorder %s27_s21, 2  ;;  %p206_p2 = scmp.lt.s32.totalorder %s875_s20, 3 }
   0x5   : > { %s1026_s21 = smov (%p29_p1, %s27_s21), 0  ;;  %p207_p3 = pnand %p740_p0, %p206_p2 }
   0x6   : > { %p239_p4 = scmp.lt.s32.totalorder (!%p207_p3), %s867_s18, 1  ;;  %v877_v0 = vmov (!%p207_p3), 0.0   ;;  %v257_v1 = vld [vmem:[%s1019_s2] sm:$0xff] (!%p207_p3)  ;;  %vm878_vm0 = vmmov (!%p207_p3), 0   ;;  %v879_v2 = vmov (!%p207_p3), 0   ;;  %vm267_vm1 = vcmask (!%p207_p3), 1041408  }
   0x7   : > { %210 = sbr.rel (%p207_p3) target bundleno = 701 (0x2bd), region = 40  ;;  %777 = vmatprep.subr.bf16.mxu0 (!%p207_p3), %v877_v0  ;;  %783 = vmatprep.subr.bf16.mxu1 (!%p207_p3), %v877_v0  ;;  %v649_v5 = vld [vmem:[%s1021_s4] sm:$0xff] (!%p207_p3)  ;;  %vm263_vm2 = vcmask (!%p207_p3), 31744   ;;  %vm367_vm3 = vcmask (!%p207_p3), 1043456   ;;  %vm363_vm4 = vcmask (!%p207_p3), 64512   ;;  %vm657_vm5 = vcmask (!%p207_p3), 523264  }
   0x8   : > { %779 = vmatprep.mubr.msk.bf16.mxu0 (!%p207_p3), %vm878_vm0, %v877_v0  ;;  %785 = vmatprep.mubr.msk.bf16.mxu1 (!%p207_p3), %vm878_vm0, %v877_v0  ;;  %v255_v8 = vld [vmem:[%s1018_s1] sm:$0xf] (!%p207_p3)  ;;  %v747_v27 = vld [vmem:[%s1020_s3 + $0x4] sm:$0xf] (!%p207_p3)  ;;  %v752_v50 = vld [vmem:[%s1020_s3 + $0x8] sm:$0xf] (!%p207_p3) }
   0x9   : > { %852 = vset.pattern.permute.xlu0 (!%p207_p3), %v879_v2  ;;  %v313_v28 = vld [vmem:[%s1020_s3] sm:$0xf] (!%p207_p3)  ;;  %v756_v58 = vld [vmem:[%s1020_s3 + $0xc] sm:$0xf] (!%p207_p3) }
   0xa   : > { %260 = vperm.xlu0 (!%p207_p3), %852, %v257_v1  }
   0xe   : > { %s1028_s18 = smov (!%p239_p4, %s867_s18), 1  ;;  %652 = vperm.xlu0 %852, %v649_v5  }
   0xf   : > { %s760_s24 = sshll.u32 %s1028_s18, 3 }
  0x10   : > { %s945_s27 = scalar_lea.vmem %s1017_s0, %s760_s24  ;;  %s253_s17 = scalar_lea.vmem %s1022_s5, %s760_s24 }
  0x11   : > { %v256_v3 = vld [vmem:[%s945_s27] sm:$0x3]  ;;  %v745_v4 = vld [vmem:[%s945_s27 + $0x2] sm:$0x3]  ;;  %v750_v24 = vld [vmem:[%s945_s27 + $0x4] sm:$0x3] }
  0x12   : > { %v269_v6 = vsel %vm267_vm1, %v256_v3, 0  ;;  %v317_v7 = vsel %vm267_vm1, %v745_v4, 0  ;;  %v460_v29 = vsel %vm267_vm1, %v750_v24, 0  ;;  %v754_v30 = vld [vmem:[%s945_s27 + $0x6] sm:$0x3] }
  0x13   : > { %778 = vmatpush3.bf16.msra.mxu0 %v269_v6  ;;  %784 = vmatpush3.bf16.msra.mxu1 %v317_v7  ;;  %v556_v31 = vsel %vm267_vm1, %v754_v30, 0 }
  0x14   : > { %789 = vmatprep.subr.bf16.mxu0 %v877_v0  ;;  %795 = vmatprep.subr.bf16.mxu1 %v877_v0 }
  0x16   : > { %780 = vmatmul.mubr.msk.bf16.vlgmr.msra.gmra.mrb[0].mxu0 %vm263_vm2, %v255_v8  ;;  %786 = vmatmul.mubr.msk.bf16.vlgmr.msra.gmra.mrb[0].mxu1 %vm263_vm2, %v255_v8 }
  0x17   : > { %791 = vmatprep.mubr.msk.bf16.mxu0 %vm878_vm0, %v877_v0  ;;  %797 = vmatprep.mubr.msk.bf16.mxu1 %vm878_vm0, %v877_v0 }
  0x89   : > { %v261_v9 = vpop.permute.xlu0 %260 }
  0xe9   : > { %v305_v10 = vpop.f32.mrb[0].mxu0  ;;  %v353_v11 = vpop.f32.mrb[0].mxu1 }
  0xea   : > { %v306_v12 = vadd.f32 %v305_v10, %v261_v9  ;;  %v354_v13 = vadd.f32 %v353_v11, %v261_v9  ;;  %v787_v14 = vpop.f32.mrb[1].mxu1  ;;  %v781_v15 = vpop.f32.mrb[1].mxu0 }
  0xeb   : > { %v356_v16 = vpop.f32.mrb[2].mxu1  ;;  %v308_v17 = vpop.f32.mrb[2].mxu0 }
  0xec   : > { %v311_v18 = vmax.f32 %v306_v12, 0.0  ;;  %v359_v19 = vmax.f32 %v354_v13, 0.0  ;;  %v788_v20 = vpop.f32.mrb[3].mxu1  ;;  %v782_v21 = vpop.f32.mrb[3].mxu0 }
  0xee   : > { %v312_v22 = vpack.c.bf16 %v311_v18, %v311_v18  ;;  %v360_v23 = vpack.c.bf16 %v359_v19, %v359_v19 }
  0xf0   : > { %v369_v25 = vsel %vm367_vm3, %v360_v23, 0  ;;  %v415_v26 = vsel %vm367_vm3, %v312_v22, 0 }
  0xf1   : > { %790 = vmatpush3.bf16.msra.mxu0 %v369_v25  ;;  %796 = vmatpush3.bf16.msra.mxu1 %v415_v26 }
  0xf2   : > { %801 = vmatprep.subr.bf16.mxu0 %v877_v0  ;;  %807 = vmatprep.subr.bf16.mxu1 %v877_v0 }
  0xf4   : > { %792 = vmatmul.mubr.msk.bf16.vlgmr.msra.gmra.mrb[4].mxu0 %vm363_vm4, %v747_v27  ;;  %798 = vmatmul.mubr.msk.bf16.vlgmr.msra.gmra.mrb[4].mxu1 %vm363_vm4, %v313_v28 }
  0xf5   : > { %802 = vmatpush3.bf16.msra.mxu0 %v460_v29  ;;  %803 = vmatprep.mubr.msk.bf16.mxu0 %vm878_vm0, %v877_v0 }
  0xf6   : > { %813 = vmatprep.subr.bf16.mxu0 %v877_v0  ;;  %809 = vmatprep.mubr.msk.bf16.mxu1 %vm878_vm0, %v877_v0 }
  0xfc   : > { %804 = vmatmul.mubr.msk.bf16.vlgmr.msra.gmra.mrb[8].mxu0 %vm263_vm2, %v255_v8 }
  0xfd   : > { %814 = vmatpush3.bf16.msra.mxu0 %v556_v31  ;;  %815 = vmatprep.mubr.msk.bf16.mxu0 %vm878_vm0, %v877_v0 }
 0x104   : > { %816 = vmatmul.mubr.msk.bf16.vlgmr.msra.gmra.mrb[12].mxu0 %vm263_vm2, %v255_v8 }
 0x1c7   : > { %v405_v32 = vpop.f32.mrb[4].mxu0  ;;  %v451_v33 = vpop.f32.mrb[4].mxu1 }
 0x1c8   : > { %v452_v34 = vadd.f32 %v451_v33, %v405_v32  ;;  %v793_v35 = vpop.f32.mrb[5].mxu0  ;;  %v799_v36 = vpop.f32.mrb[5].mxu1 }
 0x1c9   : > { %v408_v37 = vpop.f32.mrb[6].mxu0  ;;  %v454_v38 = vpop.f32.mrb[6].mxu1 }
 0x1ca   : > { %v794_v39 = vpop.f32.mrb[7].mxu0  ;;  %v800_v40 = vpop.f32.mrb[7].mxu1 }
 0x1cf   : > { %v496_v41 = vpop.f32.mrb[8].mxu0 }
 0x1d0   : > { %v497_v42 = vadd.f32 %v496_v41, %v261_v9  ;;  %v805_v43 = vpop.f32.mrb[9].mxu0 }
 0x1d1   : > { %v499_v44 = vpop.f32.mrb[10].mxu0 }
 0x1d2   : > { %v502_v45 = vmax.f32 %v497_v42, 0.0  ;;  %v806_v46 = vpop.f32.mrb[11].mxu0 }
 0x1d4   : > { %v503_v47 = vpack.c.bf16 %v502_v45, %v502_v45 }
 0x1d6   : > { %v510_v48 = vsel %vm367_vm3, %v503_v47, 0 }
 0x1d7   : > { %808 = vmatpush3.bf16.msra.mxu1 %v510_v48  ;;  %v592_v49 = vpop.f32.mrb[12].mxu0 }
 0x1d8   : > { %v593_v51 = vadd.f32 %v592_v49, %v261_v9  ;;  %v817_v52 = vpop.f32.mrb[13].mxu0  ;;  %819 = vmatprep.subr.bf16.mxu1 %v877_v0 }
 0x1d9   : > { %v595_v53 = vpop.f32.mrb[14].mxu0 }
 0x1da   : > { %v598_v54 = vmax.f32 %v593_v51, 0.0  ;;  %810 = vmatmul.mubr.msk.bf16.vlgmr.msra.gmra.mrb[8].mxu1 %vm363_vm4, %v752_v50  ;;  %v818_v55 = vpop.f32.mrb[15].mxu0 }
 0x1db   : > { %821 = vmatprep.mubr.msk.bf16.mxu1 %vm878_vm0, %v877_v0  ;;  %v653_v0 = vpop.permute.xlu0 %652 }
 0x1dc   : > { %v599_v56 = vpack.c.bf16 %v598_v54, %v598_v54 }
 0x1de   : > { %v606_v57 = vsel %vm367_vm3, %v599_v56, 0 }
 0x1df   : > { %820 = vmatpush3.bf16.msra.mxu1 %v606_v57 }
 0x1e2   : > { %822 = vmatmul.mubr.msk.bf16.vlgmr.msra.gmra.mrb[12].mxu1 %vm363_vm4, %v756_v58 }
 0x2ad   : > { %v546_v59 = vpop.f32.mrb[8].mxu1 }
 0x2ae   : > { %v552_v60 = vadd.f32 %v546_v59, %v452_v34  ;;  %v811_v61 = vpop.f32.mrb[9].mxu1 }
 0x2af   : > { %v549_v62 = vpop.f32.mrb[10].mxu1 }
 0x2b0   : > { %v812_v63 = vpop.f32.mrb[11].mxu1 }
 0x2b5   : > { %v642_v1 = vpop.f32.mrb[12].mxu1 }
 0x2b6   : > { %v648_v2 = vadd.f32 %v642_v1, %v552_v60  ;;  %v823_v3 = vpop.f32.mrb[13].mxu1 }
 0x2b7   : > { %v645_v4 = vpop.f32.mrb[14].mxu1 }
 0x2b8   : > { %v655_v5 = vadd.f32 %v653_v0, %v648_v2  ;;  %v824_v6 = vpop.f32.mrb[15].mxu1 }
 0x2ba   : > { %v656_v7 = vmax.f32 %v655_v5, 0.0 }
 0x2bc   : > { %658 = vst.msk [vmem:[%s253_s17] sm:$0xff] %vm657_vm5, %v656_v7 }
 0x2bd PF: > { %s15_s20 = sadd.s32 1, %s875_s20   ;;  %s1023_s18 = smov %s871_s19 }
 0x2be   : > { %p12_p5 = scmp.ge.s32.totalorder %s15_s20, 4   ;;  %s1024_s19 = smov %s1026_s21 }
 0x2c0   :  { %14 = sbr.rel (!%p12_p5) target bundleno = 2 (0x2), region = 76 }

</bundles_post_ra>
